<compile_context>
chip_gen: v6e
topology: v6e:2x2x1
jax: 0.10.0
libtpu: 0.0.40
codegen_flags: <defaults>
</compile_context>

<pallas_src>
import functools

import jax
import jax.numpy as jnp
import numpy as np
from jax.experimental import pallas as pl
from jax.experimental.pallas import tpu as pltpu

NUM_CLASSES = 7      # len(CLASS_MAPPING) — HAM10000-style skin lesion classes
TEXT_DIM    = 768    # BLIP-2 vision pooler_output width
HIDDEN      = 256    # fusion hidden width
CLS_PAD     = 128    # class dim padded to one full lane tile (lane-dense stores / tiles)


def _round_up(x, m):
    return -(-x // m) * m


# ----------------------------------------------------------------------------
# Kernel bodies
# ----------------------------------------------------------------------------
def _vis_head(x_ref, wv_ref, bv_ref, hw):
    """Surrogate classifier head: global average pool + tiny linear.

    Done entirely on VPU/XLU — a K=C, N=7 matmul is far too small for the MXU.
    x_ref is [bb, C*hw] in its native dtype (channels contiguous on lanes);
    accumulation is f32.  wv_ref is [C, CLS_PAD] (zero beyond NUM_CLASSES),
    bv_ref is [1, CLS_PAD].  Returns [bb, CLS_PAD] f32 visual logits.
    Slice starts are static multiples of hw; when hw % 128 == 0 (e.g. 32x32,
    224x224) every slice is lane-tile aligned.
    """
    bb = x_ref.shape[0]
    n_chan = x_ref.shape[1] // hw
    inv_hw = 1.0 / float(hw)
    vis = jnp.broadcast_to(bv_ref[...], (bb, bv_ref.shape[-1]))          # [bb, CLS_PAD]
    for c in range(n_chan):                                              # static unroll
        xc = x_ref[:, c * hw:(c + 1) * hw].astype(jnp.float32)           # native dtype -> f32
        pooled_c = jnp.sum(xc, axis=-1, keepdims=True) * inv_hw          # [bb, 1]  (XLU reduce)
        vis = vis + pooled_c * wv_ref[c:c + 1, :]                        # [bb, CLS_PAD] (VPU)
    return vis


def _visual_kernel(hw, x_ref, wv_ref, bv_ref, o_ref):
    # Tensor-input path of the module: visual logits only (lane-dense padded).
    o_ref[...] = _vis_head(x_ref, wv_ref, bv_ref, hw)


def _fused_kernel(hw, x_ref, text_ref, wv_ref, bv_ref,
                  w1v_ref, w1t_ref, b1_ref, w2_ref, b2_ref, o_ref):
    # Visual logits on VPU/XLU (f32).
    vis = _vis_head(x_ref, wv_ref, bv_ref, hw)                           # [bb, CLS_PAD]
    # Fusion Linear #1 split at the visual/text boundary (same math as the original
    # cat([vis, text]) @ w1).  bf16 operands, f32 accumulation on the MXU.
    txt = text_ref[...].astype(jnp.bfloat16)
    h = (jnp.dot(txt, w1t_ref[...], preferred_element_type=jnp.float32)
         + jnp.dot(vis.astype(jnp.bfloat16), w1v_ref[...],
                   preferred_element_type=jnp.float32)
         + b1_ref[...])
    h = jnp.maximum(h, 0.0)                                              # ReLU
    # Dropout(p=0.3) is identity at inference (torch.no_grad / eval semantics).
    o_ref[...] = (jnp.dot(h.astype(jnp.bfloat16), w2_ref[...],
                          preferred_element_type=jnp.float32)
                  + b2_ref[...])                                         # [bb, CLS_PAD]


# ----------------------------------------------------------------------------
# Generation-aware VMEM / block sizing
# ----------------------------------------------------------------------------
def _vmem_capacity_bytes():
    try:
        info = pltpu.get_tpu_info()
        cap = getattr(info, "vmem_capacity_bytes", None)
        if cap:
            return int(cap)
    except Exception:
        pass
    return 64 * 1024 * 1024            # conservative (v7x-sized) fallback


@functools.lru_cache(maxsize=None)
def _budgets():
    """(per-block image budget, vmem_limit_bytes) for the current chip."""
    cap = _vmem_capacity_bytes()
    if cap >= 100 * 1024 * 1024:       # v5e / v6e: 128 MiB physical VMEM
        return 20 * 1024 * 1024, 64 * 1024 * 1024
    return 8 * 1024 * 1024, 32 * 1024 * 1024        # v7x (64 MiB) / unknown


@functools.lru_cache(maxsize=None)
def _compiler_params():
    _, vmem_limit = _budgets()
    return pltpu.CompilerParams(
        dimension_semantics=("parallel",),   # batch axis shards across v7x's 2 TCs
        vmem_limit_bytes=vmem_limit,
    )


def _choose_block_b(batch, row_bytes):
    """Batch block size: VMEM-budgeted, (8,·)-tileable, and >= 2 grid steps for B >= 16."""
    if batch <= 8:
        return batch                              # full-dim block; single step for tiny B
    budget, _ = _budgets()
    bb = (budget // max(row_bytes, 1)) // 8 * 8
    bb = max(8, min(bb, 1024, _round_up(batch, 8)))
    if batch >= 16:
        # Cap at round_up(ceil(B/2), 8): guarantees >= 2 grid steps so the
        # "parallel" axis can use both v7x TensorCores and DMA double-buffering
        # actually overlaps input/output traffic.
        bb = min(bb, _round_up(-(-batch // 2), 8))
    return bb


def _full_spec(shape):
    # Untiled (resident) operand: full-extent block, constant block index.
    return pl.BlockSpec(shape, lambda i: (0,) * len(shape))


# ----------------------------------------------------------------------------
# pallas_call wrappers (batch-blocked, single dispatch per path, no input padding)
# ----------------------------------------------------------------------------
def _visual_forward(x_flat, params, hw):
    B, chw = x_flat.shape
    block_b = _choose_block_b(B, chw * x_flat.dtype.itemsize)
    grid = (pl.cdiv(B, block_b),)
    out = pl.pallas_call(
        functools.partial(_visual_kernel, hw),
        out_shape=jax.ShapeDtypeStruct((B, CLS_PAD), jnp.float32),
        grid_spec=pltpu.PrefetchScalarGridSpec(
            num_scalar_prefetch=0,
            grid=grid,
            in_specs=[
                pl.BlockSpec((block_b, chw), lambda i: (i, 0)),
                _full_spec(params["wv"].shape),
                _full_spec(params["bv"].shape),
            ],
            out_specs=pl.BlockSpec((block_b, CLS_PAD), lambda i: (i, 0)),
        ),
        compiler_params=_compiler_params(),
    )(x_flat, params["wv"], params["bv"])
    return out[:, :NUM_CLASSES]


def _fused_forward(x_flat, text, params, hw):
    B, chw = x_flat.shape
    block_b = _choose_block_b(B, chw * x_flat.dtype.itemsize)
    grid = (pl.cdiv(B, block_b),)
    out = pl.pallas_call(
        functools.partial(_fused_kernel, hw),
        out_shape=jax.ShapeDtypeStruct((B, CLS_PAD), jnp.float32),
        grid_spec=pltpu.PrefetchScalarGridSpec(
            num_scalar_prefetch=0,
            grid=grid,
            in_specs=[
                pl.BlockSpec((block_b, chw), lambda i: (i, 0)),
                pl.BlockSpec((block_b, TEXT_DIM), lambda i: (i, 0)),
                _full_spec(params["wv"].shape),
                _full_spec(params["bv"].shape),
                _full_spec(params["w1v"].shape),
                _full_spec(params["w1t"].shape),
                _full_spec(params["b1"].shape),
                _full_spec(params["w2"].shape),
                _full_spec(params["b2"].shape),
            ],
            out_specs=pl.BlockSpec((block_b, CLS_PAD), lambda i: (i, 0)),
        ),
        compiler_params=_compiler_params(),
    )(x_flat, text, params["wv"], params["bv"], params["w1v"], params["w1t"],
      params["b1"], params["w2"], params["b2"])
    return out[:, :NUM_CLASSES]


# ----------------------------------------------------------------------------
# Parameter initialization (deterministic, PyTorch nn.Linear-style uniform)
# ----------------------------------------------------------------------------
def _linear_init(key, fan_in, fan_out):
    kw, kb = jax.random.split(key)
    bound = 1.0 / float(np.sqrt(fan_in))
    w = jax.random.uniform(kw, (fan_in, fan_out), jnp.float32, -bound, bound)
    b = jax.random.uniform(kb, (1, fan_out), jnp.float32, -bound, bound)
    return w, b


def init_params(key, in_channels=3):
    kv, k1, k2 = jax.random.split(key, 3)
    wv, bv = _linear_init(kv, in_channels, NUM_CLASSES)          # surrogate classifier head
    # Fusion layer drawn as a single [7+768, 256] matrix, then split at the
    # visual/text boundary — row order matches torch.cat([visual, text], dim=1).
    w1, b1 = _linear_init(k1, NUM_CLASSES + TEXT_DIM, HIDDEN)
    w2, b2 = _linear_init(k2, HIDDEN, NUM_CLASSES)

    # Zero-pad the class dimension to 128 lanes: padded visual-logit columns stay
    # exactly zero, padded w1_vis rows / w2 columns contribute nothing, so padding
    # is correctness-preserving while keeping every tile lane-dense.
    wv_pad  = jnp.zeros((in_channels, CLS_PAD), jnp.float32).at[:, :NUM_CLASSES].set(wv)
    bv_pad  = jnp.zeros((1, CLS_PAD), jnp.float32).at[:, :NUM_CLASSES].set(bv)
    w1v_pad = jnp.zeros((CLS_PAD, HIDDEN), jnp.float32).at[:NUM_CLASSES, :].set(w1[:NUM_CLASSES])
    w1t     = w1[NUM_CLASSES:]
    w2_pad  = jnp.zeros((HIDDEN, CLS_PAD), jnp.float32).at[:, :NUM_CLASSES].set(w2)
    b2_pad  = jnp.zeros((1, CLS_PAD), jnp.float32).at[:, :NUM_CLASSES].set(b2)
    return dict(
        # VPU pooling path stays f32 (v5e VPU has no bf16 arithmetic).
        wv=wv_pad, bv=bv_pad, b1=b1, b2=b2_pad,
        # MXU operands stored bf16: halves the resident weight stream / VMEM footprint.
        w1v=w1v_pad.astype(jnp.bfloat16),
        w1t=w1t.astype(jnp.bfloat16),
        w2=w2_pad.astype(jnp.bfloat16),
    )


# ----------------------------------------------------------------------------
# Forward pass (mirrors MultimodalDermAI.forward)
# ----------------------------------------------------------------------------
def multimodal_derm_ai_forward(x_nchw, params, text_features=None, use_multimodal=True):
    B, C, H, W = x_nchw.shape
    hw = H * W
    # Contiguous metadata-only reshape; image keeps its NATIVE dtype (no f32 upcast pass).
    x_flat = x_nchw.reshape(B, C * hw)
    if use_multimodal and text_features is not None:
        # Non-tensor-input branch of the module: classifier + BLIP-2 features + fusion head.
        return _fused_forward(x_flat, text_features, params, hw)
    # Tensor-input branch: visual logits only.
    return _visual_forward(x_flat, params, hw)


# ----------------------------------------------------------------------------
# Pure-JAX reference (same math, un-fused) for correctness checks
# ----------------------------------------------------------------------------
def _reference_forward(x_nchw, params, text_features=None):
    B, C, H, W = x_nchw.shape
    wv = params["wv"][:, :NUM_CLASSES]
    bv = params["bv"][:, :NUM_CLASSES]
    pooled = x_nchw.astype(jnp.float32).reshape(B, C, H * W).mean(-1)
    vis = pooled @ wv + bv
    if text_features is None:
        return vis
    w1 = jnp.concatenate([params["w1v"][:NUM_CLASSES].astype(jnp.float32),
                          params["w1t"].astype(jnp.float32)], axis=0)
    comb = jnp.concatenate([vis, text_features.astype(jnp.float32)], axis=1)
    h = jnp.maximum(comb @ w1 + params["b1"], 0.0)
    return (h @ params["w2"].astype(jnp.float32)[:, :NUM_CLASSES]
            + params["b2"][:, :NUM_CLASSES])


# ----------------------------------------------------------------------------
if __name__ == "__main__":
    key = jax.random.PRNGKey(0)
    kx, kt, kp, kx2, kt2 = jax.random.split(key, 5)

    B, C, H, W = 2, 3, 32, 32
    x = jax.random.normal(kx, (B, C, H, W), jnp.float32)
    # Surrogate BLIP-2 pooler_output (768-d)  # TODO(synk): real BLIP-2 features.
    text_features = jax.random.normal(kt, (B, TEXT_DIM), jnp.float32)
    params = init_params(kp, in_channels=C)

    # Path 1: tensor input -> visual logits only (exact module semantics).
    visual_logits = multimodal_derm_ai_forward(x, params, text_features=None)
    # Path 2: multimodal fusion path (non-tensor input branch of the module).
    final_logits = multimodal_derm_ai_forward(x, params, text_features=text_features)
    jax.block_until_ready((visual_logits, final_logits))
    assert visual_logits.shape == (B, NUM_CLASSES)
    assert final_logits.shape == (B, NUM_CLASSES)
    assert jnp.all(jnp.isfinite(visual_logits)) and jnp.all(jnp.isfinite(final_logits))

    ref_vis = _reference_forward(x, params, None)
    ref_fin = _reference_forward(x, params, text_features)
    # Visual path is all-f32 -> tight tolerance; fused path uses bf16 MXU operands
    # (by design) -> bf16-appropriate tolerance.
    np.testing.assert_allclose(np.asarray(visual_logits), np.asarray(ref_vis),
                               rtol=1e-5, atol=1e-5)
    np.testing.assert_allclose(np.asarray(final_logits), np.asarray(ref_fin),
                               rtol=2e-2, atol=2e-2)

    # Native-dtype image path (no wrapper upcast): bf16 image through the same kernel.
    x_bf16 = x.astype(jnp.bfloat16)
    vis_bf16 = multimodal_derm_ai_forward(x_bf16, params, text_features=None)
    jax.block_until_ready(vis_bf16)
    np.testing.assert_allclose(np.asarray(vis_bf16), np.asarray(ref_vis),
                               rtol=2e-2, atol=2e-2)

    # Multi-step grid + ragged last block (B=20 -> block_b=16, grid=(2,), no jnp.pad).
    B2 = 20
    x2 = jax.random.normal(kx2, (B2, C, H, W), jnp.float32)
    t2 = jax.random.normal(kt2, (B2, TEXT_DIM), jnp.float32)
    fin2 = multimodal_derm_ai_forward(x2, params, text_features=t2)
    jax.block_until_ready(fin2)
    assert fin2.shape == (B2, NUM_CLASSES)
    np.testing.assert_allclose(np.asarray(fin2),
                               np.asarray(_reference_forward(x2, params, t2)),
                               rtol=2e-2, atol=2e-2)

    print("KERNEL_OK")
</pallas_src>

<mosaic_0001>
module attributes {stable_mosaic.version = 11 : i64} {
  func.func @_visual_kernel(%arg0: i32, %arg1: memref<2x3072xf32, #tpu.memory_space<vmem>>, %arg2: memref<3x128xf32, #tpu.memory_space<vmem>>, %arg3: memref<1x128xf32, #tpu.memory_space<vmem>>, %arg4: memref<2x128xf32, #tpu.memory_space<vmem>>) attributes {dimension_semantics = [#tpu.dimension_semantics<parallel>], iteration_bounds = array<i64: 1>, scalar_prefetch = 0 : i64, scratch_operands = 0 : i64, tpu.core_type = #tpu.core_type<tc>, window_params = [{transform_indices = @transform_0, window_bounds = array<i64: 2, 3072>}, {pipeline_mode = #tpu.pipeline_mode<synchronous>, transform_indices = @transform_1, window_bounds = array<i64: 3, 128>}, {pipeline_mode = #tpu.pipeline_mode<synchronous>, transform_indices = @transform_2, window_bounds = array<i64: 1, 128>}, {transform_indices = @transform_3, window_bounds = array<i64: 2, 128>}]} {
    %c0 = arith.constant 0 : index
    %c0_0 = arith.constant 0 : index
    %0 = vector.load %arg3[%c0, %c0_0] : memref<1x128xf32, #tpu.memory_space<vmem>>, vector<1x128xf32>
    %1 = vector.shape_cast %0 : vector<1x128xf32> to vector<1x128xf32>
    %2 = vector.broadcast %1 : vector<1x128xf32> to vector<2x128xf32>
    %c0_1 = arith.constant 0 : index
    %c0_2 = arith.constant 0 : index
    %3 = vector.load %arg1[%c0_1, %c0_2] : memref<2x3072xf32, #tpu.memory_space<vmem>>, vector<2x1024xf32>
    %cst = arith.constant dense<0.000000e+00> : vector<2xf32>
    %4 = vector.multi_reduction <add>, %3, %cst [1] : vector<2x1024xf32> to vector<2xf32>
    %5 = vector.shape_cast %4 : vector<2xf32> to vector<2x1xf32>
    %cst_3 = arith.constant 9.765625E-4 : f32
    %6 = vector.broadcast %cst_3 : f32 to vector<2x1xf32>
    %7 = arith.mulf %5, %6 : vector<2x1xf32>
    %c0_4 = arith.constant 0 : index
    %c0_5 = arith.constant 0 : index
    %8 = vector.load %arg2[%c0_4, %c0_5] : memref<3x128xf32, #tpu.memory_space<vmem>>, vector<1x128xf32>
    %9 = vector.broadcast %7 : vector<2x1xf32> to vector<2x128xf32>
    %10 = vector.broadcast %8 : vector<1x128xf32> to vector<2x128xf32>
    %11 = arith.mulf %9, %10 : vector<2x128xf32>
    %12 = arith.addf %2, %11 : vector<2x128xf32>
    %c0_6 = arith.constant 0 : index
    %c1024 = arith.constant 1024 : index
    %13 = vector.load %arg1[%c0_6, %c1024] : memref<2x3072xf32, #tpu.memory_space<vmem>>, vector<2x1024xf32>
    %cst_7 = arith.constant dense<0.000000e+00> : vector<2xf32>
    %14 = vector.multi_reduction <add>, %13, %cst_7 [1] : vector<2x1024xf32> to vector<2xf32>
    %15 = vector.shape_cast %14 : vector<2xf32> to vector<2x1xf32>
    %cst_8 = arith.constant 9.765625E-4 : f32
    %16 = vector.broadcast %cst_8 : f32 to vector<2x1xf32>
    %17 = arith.mulf %15, %16 : vector<2x1xf32>
    %c1 = arith.constant 1 : index
    %c0_9 = arith.constant 0 : index
    %18 = vector.load %arg2[%c1, %c0_9] : memref<3x128xf32, #tpu.memory_space<vmem>>, vector<1x128xf32>
    %19 = vector.broadcast %17 : vector<2x1xf32> to vector<2x128xf32>
    %20 = vector.broadcast %18 : vector<1x128xf32> to vector<2x128xf32>
    %21 = arith.mulf %19, %20 : vector<2x128xf32>
    %22 = arith.addf %12, %21 : vector<2x128xf32>
    %c0_10 = arith.constant 0 : index
    %c2048 = arith.constant 2048 : index
    %23 = vector.load %arg1[%c0_10, %c2048] : memref<2x3072xf32, #tpu.memory_space<vmem>>, vector<2x1024xf32>
    %cst_11 = arith.constant dense<0.000000e+00> : vector<2xf32>
    %24 = vector.multi_reduction <add>, %23, %cst_11 [1] : vector<2x1024xf32> to vector<2xf32>
    %25 = vector.shape_cast %24 : vector<2xf32> to vector<2x1xf32>
    %cst_12 = arith.constant 9.765625E-4 : f32
    %26 = vector.broadcast %cst_12 : f32 to vector<2x1xf32>
    %27 = arith.mulf %25, %26 : vector<2x1xf32>
    %c2 = arith.constant 2 : index
    %c0_13 = arith.constant 0 : index
    %28 = vector.load %arg2[%c2, %c0_13] : memref<3x128xf32, #tpu.memory_space<vmem>>, vector<1x128xf32>
    %29 = vector.broadcast %27 : vector<2x1xf32> to vector<2x128xf32>
    %30 = vector.broadcast %28 : vector<1x128xf32> to vector<2x128xf32>
    %31 = arith.mulf %29, %30 : vector<2x128xf32>
    %32 = arith.addf %22, %31 : vector<2x128xf32>
    %c0_14 = arith.constant 0 : index
    %c0_15 = arith.constant 0 : index
    %33 = vector.load %arg4[%c0_14, %c0_15] : memref<2x128xf32, #tpu.memory_space<vmem>>, vector<2x128xf32>
    tpu.vector_store %arg4[%c0_14, %c0_15], %32 {strides = array<i32>} : memref<2x128xf32, #tpu.memory_space<vmem>>, vector<2x128xf32>,
    return
  }
  func.func @transform_0(%arg0: i32) -> (i32, i32) {
    %c0_i32 = arith.constant 0 : i32
    %c0_i32_0 = arith.constant 0 : i32
    return %arg0, %c0_i32 : i32, i32
  }
  func.func @transform_1(%arg0: i32) -> (i32, i32) {
    %c0_i32 = arith.constant 0 : i32
    %c0_i32_0 = arith.constant 0 : i32
    %c0_i32_1 = arith.constant 0 : i32
    return %c0_i32, %c0_i32_0 : i32, i32
  }
  func.func @transform_2(%arg0: i32) -> (i32, i32) {
    %c0_i32 = arith.constant 0 : i32
    %c0_i32_0 = arith.constant 0 : i32
    %c0_i32_1 = arith.constant 0 : i32
    return %c0_i32, %c0_i32_0 : i32, i32
  }
  func.func @transform_3(%arg0: i32) -> (i32, i32) {
    %c0_i32 = arith.constant 0 : i32
    %c0_i32_0 = arith.constant 0 : i32
    return %arg0, %c0_i32 : i32, i32
  }
}

</mosaic_0001>

<bundles_post_ra>
// kernel: tpu_custom_call.1
= control target key start
LH: loop header
LB: loop body
LE: loop exit
PB: predicated region body
PF: predicated region fallthrough
CT: control target
= control target key end

     0   :  { %8 = vsyncpa [#allocation3], 0  ;;  %s431_s0 = inlined_call_operand.hbm [shape: f32[2,3072], index: 0, kind: input, shape index: {}]   ;;  %s432_s1 = inlined_call_operand.hbm [shape: f32[3,128], index: 1, kind: input, shape index: {}]   ;;  %s433_s2 = inlined_call_operand.vmem [shape: f32[1,128], index: 2, kind: input, shape index: {}]   ;;  %s434_s3 = inlined_call_operand.hbm [shape: f32[2,128], index: 3, kind: output, shape index: {}]  }
   0x1   :  { %9 = vsyncpa [#allocation6], 0 }
   0x2   :  { %10 = vsyncpa [#allocation4], 0  ;;  %s357_s12 = smov [#allocation2]   ;;  %s358_s14 = smov [#allocation5]  }
   0x3   :  { %s17_s13 = sshll.u32 %s357_s12, 4  ;;  %s27_s15 = sshll.u32 %s358_s14, 4  ;;  %s18_s13 = int_to_ptr.vmem [resolvable:$true] %s17_s13  ;;  %s28_s15 = int_to_ptr.vmem [resolvable:$true] %s27_s15 }
   0x4   :  { %s299_s16 = scalar_lea.vmem %s18_s13, 768  ;;  %p304_p1 = scmp.lt.s32.totalorder %s18_s13, %s18_s13 }
   0x5   :  { %p300_p0 = scmp.ne.s32.totalorder %s18_s13, %s299_s16  ;;  %p305_p2 = scmp.lt.s32.totalorder %s299_s16, %s299_s16 }
   0x7   :  { %p306_p3 = por %p305_p2, %p304_p1 }
   0x9   :  { %p307_p4 = pnand %p306_p3, %p300_p0 }
   0xb   :  { %310 = shalt.err (!%p307_p4)
}
   0xc   :  { %20 = dma.hbm_to_vmem [thread:$0]  %s431_s0, 768, %s18_s13, [#allocation3]  }
   0xd   :  { %s319_s19 = scalar_lea.vmem %s28_s15, 64  ;;  %p324_p6 = scmp.lt.s32.totalorder %s28_s15, %s28_s15 }
   0xe   :  { %p320_p5 = scmp.ne.s32.totalorder %s28_s15, %s319_s19  ;;  %p325_p7 = scmp.lt.s32.totalorder %s319_s19, %s319_s19 }
  0x10   :  { %p326_p8 = por %p325_p7, %p324_p6 }
  0x12   :  { %p327_p9 = pnand %p326_p8, %p320_p5 }
  0x14   :  { %330 = shalt.err (!%p327_p9)
}
  0x15   :  { %30 = dma.hbm_to_vmem [thread:$0]  %s432_s1, 64, %s28_s15, [#allocation6]  }
  0x16   :  { %351 = dma.done.wait [#allocation3], 768  }
  0x17   :  { %352 = vsyncadd [#allocation3], 4294966528 }
  0x18   :  { %353 = dma.done.wait [#allocation6], 64  }
  0x19   :  { %354 = vsyncadd [#allocation6], 4294967232  ;;  %v54_v0 = vlaneseq  ;;  %v359_v1 = vmov 1983009808   ;;  %v46_v6 = vld [vmem:[#allocation2] sm:$0xff]  ;;  %v47_v7 = vld [vmem:[#allocation2 + $0x8] sm:$0xff] }
  0x1a   :  { %v52_v2 = vunpack.c.l.s4 %v359_v1  ;;  %v118_v8 = vld [vmem:[#allocation2 + $0x10] sm:$0xff]  ;;  %v50_v9 = vcombine.high %v46_v6, %v46_v6  ;;  %v67_v11 = vcombine.high %v47_v7, %v47_v7  ;;  %vm92_vm0 = vcmask 1041408   ;;  %v119_v17 = vld [vmem:[#allocation2 + $0x18] sm:$0xff]  ;;  %v189_v35 = vld [vmem:[#allocation2 + $0x20] sm:$0xff]  ;;  %s360_s22 = smov [#allocation7]  }
  0x1b   :  { %v55_v3 = vshrl.u32 %v54_v0, 7  ;;  %v122_v12 = vcombine.high %v118_v8, %v118_v8  ;;  %v139_v21 = vcombine.high %v119_v17, %v119_v17  ;;  %v190_v43 = vld [vmem:[#allocation2 + $0x28] sm:$0xff]  ;;  %v193_v44 = vcombine.high %v189_v35, %v189_v35  ;;  %s267_s23 = sshll.u32 %s360_s22, 4  ;;  %s268_s23 = int_to_ptr.vmem [resolvable:$true] %s267_s23 }
  0x1c   :  { %v53_v4 = vunpack.c.0.s8 %v52_v2  ;;  %v210_v52 = vcombine.high %v190_v43, %v190_v43  ;;  %s331_s24 = scalar_lea.vmem %s268_s23, 32  ;;  %p336_p11 = scmp.lt.s32.totalorder %s268_s23, %s268_s23 }
  0x1d   :  { %p332_p10 = scmp.ne.s32.totalorder %s268_s23, %s331_s24  ;;  %p337_p12 = scmp.lt.s32.totalorder %s331_s24, %s331_s24 }
  0x1e   :  { %v387_v5 = vsub.s32 %v53_v4, %v55_v3 }
  0x1f   :  { %p338_p13 = por %p337_p12, %p336_p11 }
  0x20   :  { %v57_v10 = vrot.slane %v46_v6, %v387_v5  ;;  %v129_v13 = vrot.slane %v118_v8, %v387_v5  ;;  %v64_v14 = vrot.slane %v50_v9, %v387_v5  ;;  %v74_v16 = vrot.slane %v47_v7, %v387_v5 }
  0x21   :  { %v136_v19 = vrot.slane %v122_v12, %v387_v5  ;;  %v81_v23 = vrot.slane %v67_v11, %v387_v5  ;;  %v146_v28 = vrot.slane %v119_v17, %v387_v5  ;;  %v153_v38 = vrot.slane %v139_v21, %v387_v5  ;;  %p339_p0 = pnand %p338_p13, %p332_p10 }
  0x22   :  { %v65_v15 = vcombine.high %v57_v10, %v57_v10  ;;  %v93_v18 = vsel %vm92_vm0, %v57_v10, 0.0  ;;  %v137_v20 = vcombine.high %v129_v13, %v129_v13  ;;  %v66_v22 = vcombine.high %v64_v14, %v64_v14 }
  0x23   :  { %v96_v25 = vsel %vm92_vm0, %v64_v14, 0.0  ;;  %v138_v27 = vcombine.high %v136_v19, %v136_v19  ;;  %v82_v29 = vcombine.high %v74_v16, %v74_v16  ;;  %v164_v32 = vsel %vm92_vm0, %v129_v13, 0.0 }
  0x24   :  { %v94_v24 = vsel %vm92_vm0, %v65_v15, 0.0  ;;  %v98_v30 = vsel %vm92_vm0, %v66_v22, 0.0  ;;  %v165_v33 = vsel %vm92_vm0, %v137_v20, 0.0  ;;  %v167_v34 = vsel %vm92_vm0, %v136_v19, 0.0 }
  0x25   :  { %v95_v26 = vadd.f32 %v94_v24, %v93_v18  ;;  %v83_v36 = vcombine.high %v81_v23, %v81_v23  ;;  %v100_v37 = vsel %vm92_vm0, %v74_v16, 0.0  ;;  %v166_v39 = vadd.f32 %v165_v33, %v164_v32  ;;  %v280_v33 = vld [vmem:[#allocation5 + $0x2] ss:$0 sm:$0xff] }
  0x26   :  { %v154_v41 = vcombine.high %v146_v28, %v146_v28  ;;  %v169_v42 = vsel %vm92_vm0, %v138_v27, 0.0  ;;  %v102_v45 = vsel %vm92_vm0, %v82_v29, 0.0  ;;  %v104_v46 = vsel %vm92_vm0, %v81_v23, 0.0 }
  0x27   :  { %v97_v31 = vadd.f32 %v96_v25, %v95_v26  ;;  %v168_v47 = vadd.f32 %v167_v34, %v166_v39  ;;  %v200_v48 = vrot.slane %v189_v35, %v387_v5  ;;  %v171_v50 = vsel %vm92_vm0, %v146_v28, 0.0  ;;  %v278_v25 = vld [vmem:[#allocation5] ss:$0 sm:$0xff]  ;;  %v279_v26 = vld [vmem:[#allocation5 + $0x1] ss:$0 sm:$0xff] }
  0x28   :  { %v207_v51 = vrot.slane %v193_v44, %v387_v5  ;;  %v217_v55 = vrot.slane %v190_v43, %v387_v5  ;;  %v155_v58 = vcombine.high %v153_v38, %v153_v38  ;;  %v173_v59 = vsel %vm92_vm0, %v154_v41, 0.0 }
  0x29   :  { %v99_v40 = vadd.f32 %v98_v30, %v97_v31  ;;  %v170_v53 = vadd.f32 %v169_v42, %v168_v47  ;;  %v208_v54 = vcombine.high %v200_v48, %v200_v48  ;;  %v235_v56 = vsel %vm92_vm0, %v200_v48, 0.0  ;;  %v277_v30 = vld [vmem:[%s433_s2] ss:$0 sm:$0xff] }
  0x2a   :  { %v209_v60 = vcombine.high %v207_v51, %v207_v51  ;;  %v106_v61 = vsel %vm92_vm0, %v83_v36, 0.0  ;;  %v238_v0 = vsel %vm92_vm0, %v207_v51, 0.0  ;;  %v175_v2 = vsel %vm92_vm0, %v153_v38, 0.0 }
  0x2b   :  { %v101_v49 = vadd.f32 %v100_v37, %v99_v40  ;;  %v172_v62 = vadd.f32 %v171_v50, %v170_v53  ;;  %v236_v63 = vsel %vm92_vm0, %v208_v54, 0.0  ;;  %v224_v6 = vrot.slane %v210_v52, %v387_v5 }
  0x2c   :  { %v237_v3 = vadd.f32 %v236_v63, %v235_v56  ;;  %v225_v7 = vcombine.high %v217_v55, %v217_v55  ;;  %v240_v8 = vsel %vm92_vm0, %v209_v60, 0.0  ;;  %v177_v10 = vsel %vm92_vm0, %v155_v58, 0.0 }
  0x2d   :  { %v103_v57 = vadd.f32 %v102_v45, %v101_v49  ;;  %v174_v4 = vadd.f32 %v173_v59, %v172_v62  ;;  %v242_v13 = vsel %vm92_vm0, %v217_v55, 0.0  ;;  %v226_v16 = vcombine.high %v224_v6, %v224_v6 }
  0x2e   :  { %v239_v11 = vadd.f32 %v238_v0, %v237_v3  ;;  %v244_v17 = vsel %vm92_vm0, %v225_v7, 0.0  ;;  %v246_v19 = vsel %vm92_vm0, %v224_v6, 0.0 }
  0x2f   :  { %v105_v1 = vadd.f32 %v104_v46, %v103_v57  ;;  %v176_v12 = vadd.f32 %v175_v2, %v174_v4  ;;  %v248_v20 = vsel %vm92_vm0, %v226_v16, 0.0 }
  0x30   :  { %v241_v14 = vadd.f32 %v240_v8, %v239_v11 }
  0x31   :  { %v107_v9 = vadd.f32 %v106_v61, %v105_v1  ;;  %v178_v15 = vadd.f32 %v177_v10, %v176_v12 }
  0x32   :  { %v243_v18 = vadd.f32 %v242_v13, %v241_v14 }
  0x33   :  { %108 = vadd.xlane.f32.xlu0 %v107_v9 }
  0x34   :  { %v245_v5 = vadd.f32 %v244_v17, %v243_v18 }
  0x36   :  { %v247_v21 = vadd.f32 %v246_v19, %v245_v5 }
  0x37   :  { %179 = vadd.xlane.f32.xlu0 %v178_v15 }
  0x38   :  { %v249_v22 = vadd.f32 %v248_v20, %v247_v21 }
  0x3a   :  { %250 = vadd.xlane.f32.xlu1 %v249_v22 }
  0xbc   :  { %v109_v23 = vpop.xlane.xlu0 %108 }
  0xbd   :  { %v110_v24 = vmul.f32 0.0009765625, %v109_v23 }
  0xbf   :  { %v116_v28 = vmul.f32 %v278_v25, %v110_v24 }
  0xc0   :  { %v180_v27 = vpop.xlane.xlu0 %179 }
  0xc1   :  { %v181_v29 = vmul.f32 0.0009765625, %v180_v27  ;;  %v117_v32 = vadd.f32 %v277_v30, %v116_v28 }
  0xc3   :  { %v187_v31 = vmul.f32 %v279_v26, %v181_v29  ;;  %v251_v34 = vpop.xlane.xlu1 %250 }
  0xc4   :  { %v252_v36 = vmul.f32 0.0009765625, %v251_v34 }
  0xc5   :  { %v188_v35 = vadd.f32 %v187_v31, %v117_v32 }
  0xc6   :  { %v258_v37 = vmul.f32 %v280_v33, %v252_v36 }
  0xc8   :  { %v259_v38 = vadd.f32 %v258_v37, %v188_v35 }
  0xca   :  { %260 = vst [vmem:[#allocation7] sm:$0x3] %v259_v38 }
  0xcb   :  { %342 = shalt.err (!%p339_p0)
}
  0xcc   :  { %270 = dma.vmem_to_hbm [thread:$0]  %s268_s23, 32, %s434_s3, [#allocation4]  }
  0xcd   :  { %355 = dma.done.wait [#allocation4], 32  }
  0xce   :  { %356 = vsyncadd [#allocation4], 4294967264 }
  0xcf   :  { %274 = vsyncpa [#allocation3], 1 }
  0xd0   :  { %275 = vsyncpa [#allocation6], 1 }
  0xd1   :  { %276 = vsyncpa [#allocation4], 1 }

</bundles_post_ra>
